<compile_context>
chip_gen: v6e
topology: v6e:2x2x1
jax: 0.10.0
libtpu: 0.0.40
codegen_flags: <defaults>
</compile_context>

<pallas_src>
import functools

import jax
import jax.numpy as jnp
from jax.experimental import pallas as pl
from jax.experimental.pallas import tpu as pltpu


def _softplus(x):
    # Numerically stable softplus: softplus(x) = -log(1 - sigmoid(x)) = -log(sigmoid(-x))
    return jnp.maximum(x, 0.0) + jnp.log(1.0 + jnp.exp(-jnp.abs(x)))


def _sacn_loss_kernel(qp_ref, ap_ref, qn_ref, an_ref, out_ref, *,
                      num_neg_rows, tile_rows):
    pid = pl.program_id(0)

    # ---- negative tile: BCE(sigmoid(s), 0) = softplus(s), clamped at 100 ----
    qn = qn_ref[...]
    an = an_ref[...]
    s_neg = jnp.sum((qn * an).astype(jnp.float32), axis=-1, keepdims=True)  # (T, 1)
    neg_rows = jnp.minimum(_softplus(s_neg), 100.0)
    # mask rows past the true negative-row count (zero/garbage padding rows)
    row_idx = jax.lax.broadcasted_iota(jnp.int32, (tile_rows, 1), 0) + pid * tile_rows
    neg_rows = jnp.where(row_idx < num_neg_rows, neg_rows, 0.0)
    neg_sum = jnp.sum(neg_rows, axis=0, keepdims=True)                      # (1, 1)

    # ---- positive term folded into tile 0 only ----
    @pl.when(pid == 0)
    def _():
        qp = qp_ref[...]
        ap = ap_ref[...]
        s_pos = jnp.sum((qp * ap).astype(jnp.float32), axis=-1, keepdims=True)  # (B, 1)
        pos_rows = jnp.minimum(_softplus(-s_pos), 100.0)
        pos_sum = jnp.sum(pos_rows, axis=0, keepdims=True)                  # (1, 1)
        total = (neg_sum + pos_sum).reshape(1, 1, 1)
        out_ref[...] = jnp.broadcast_to(total, out_ref.shape)

    @pl.when(pid != 0)
    def _():
        out_ref[...] = jnp.broadcast_to(neg_sum.reshape(1, 1, 1), out_ref.shape)


def embedding_loss_sacn(query_emb, query_emb_neg, answer_emb, answer_emb_neg,
                        *, tile_rows=None):
    """query_emb/answer_emb: (B, D); query_emb_neg/answer_emb_neg: (B, N, D)."""
    b, d = query_emb.shape
    n = query_emb_neg.shape[1]
    r_neg = b * n

    # Same flattening as the .view(-1, D) calls in the PyTorch module.
    q_neg = query_emb_neg.reshape(r_neg, d)
    a_neg = answer_emb_neg.reshape(r_neg, d)

    # Lane-align the hidden dim (zero padding is dot-product neutral).
    d_pad = ((d + 127) // 128) * 128
    if d_pad != d:
        padw = [(0, 0), (0, d_pad - d)]
        query_emb = jnp.pad(query_emb, padw)
        answer_emb = jnp.pad(answer_emb, padw)
        q_neg = jnp.pad(q_neg, padw)
        a_neg = jnp.pad(a_neg, padw)

    # Sublane-align the negative rows; padded rows are masked inside the kernel.
    r_pad = ((r_neg + 7) // 8) * 8
    if r_pad != r_neg:
        q_neg = jnp.pad(q_neg, [(0, r_pad - r_neg), (0, 0)])
        a_neg = jnp.pad(a_neg, [(0, r_pad - r_neg), (0, 0)])

    # Tile size: keep each (tile_rows, d_pad) stream buffer around <= 2 MiB so
    # 2 streams x 2 pipeline buffers (+ small resident positives) fit every gen.
    if tile_rows is None:
        bytes_per_row = jnp.dtype(q_neg.dtype).itemsize * d_pad
        tile_rows = max(8, min(2048, ((2 * 1024 * 1024) // bytes_per_row) // 8 * 8))
    tile_rows = int(min(tile_rows, r_pad))
    num_tiles = pl.cdiv(r_pad, tile_rows)

    kernel = functools.partial(
        _sacn_loss_kernel, num_neg_rows=r_neg, tile_rows=tile_rows
    )

    partials = pl.pallas_call(
        kernel,
        out_shape=jax.ShapeDtypeStruct((num_tiles, 8, 128), jnp.float32),
        grid=(num_tiles,),
        in_specs=[
            pl.BlockSpec((b, d_pad), lambda i: (0, 0)),          # positives: resident
            pl.BlockSpec((b, d_pad), lambda i: (0, 0)),
            pl.BlockSpec((tile_rows, d_pad), lambda i: (i, 0)),  # negatives: row-tiled
            pl.BlockSpec((tile_rows, d_pad), lambda i: (i, 0)),
        ],
        out_specs=pl.BlockSpec((1, 8, 128), lambda i: (i, 0, 0)),
        compiler_params=pltpu.CompilerParams(
            dimension_semantics=("parallel",),
        ),
    )(query_emb, answer_emb, q_neg, a_neg)

    total = jnp.sum(partials[:, 0, 0])
    return total / (b * (1 + n))


def _reference_loss(query_emb, query_emb_neg, answer_emb, answer_emb_neg):
    """Pure-JAX reference mirroring the PyTorch forward (stable BCE form)."""
    b = query_emb.shape[0]
    n = query_emb_neg.shape[1]
    s_pos = jnp.sum(query_emb * answer_emb, axis=-1)
    qn = query_emb_neg.reshape(-1, query_emb_neg.shape[2])
    an = answer_emb_neg.reshape(-1, answer_emb_neg.shape[2])
    s_neg = jnp.sum(qn * an, axis=-1)
    # BCE(sigmoid(s), 1) = softplus(-s); BCE(sigmoid(s), 0) = softplus(s);
    # torch BCELoss clamps each log term at -100 -> per-row loss clamped at 100.
    loss_pos = jnp.sum(jnp.minimum(_softplus(-s_pos), 100.0))
    loss_neg = jnp.sum(jnp.minimum(_softplus(s_neg), 100.0))
    return (loss_pos + loss_neg) / (b * (1 + n))


if __name__ == "__main__":
    key = jax.random.PRNGKey(0)

    # Small case (single tile, row masking exercised: 6 neg rows padded to 8).
    B, N, D = 2, 3, 32
    k1, k2, k3, k4, k5, k6, k7, k8 = jax.random.split(key, 8)
    query_emb = jax.random.normal(k1, (B, D), dtype=jnp.float32)
    answer_emb = jax.random.normal(k2, (B, D), dtype=jnp.float32)
    query_emb_neg = jax.random.normal(k3, (B, N, D), dtype=jnp.float32)
    answer_emb_neg = jax.random.normal(k4, (B, N, D), dtype=jnp.float32)

    loss = embedding_loss_sacn(query_emb, query_emb_neg, answer_emb, answer_emb_neg)
    loss = jax.block_until_ready(loss)
    ref = _reference_loss(query_emb, query_emb_neg, answer_emb, answer_emb_neg)
    assert jnp.allclose(loss, ref, rtol=1e-5, atol=1e-5), (loss, ref)

    # Multi-tile case (non-128 hidden dim padded, several grid steps).
    B2, N2, D2 = 8, 40, 100
    q2 = jax.random.normal(k5, (B2, D2), dtype=jnp.float32)
    a2 = jax.random.normal(k6, (B2, D2), dtype=jnp.float32)
    qn2 = jax.random.normal(k7, (B2, N2, D2), dtype=jnp.float32)
    an2 = jax.random.normal(k8, (B2, N2, D2), dtype=jnp.float32)

    loss2 = embedding_loss_sacn(q2, qn2, a2, an2, tile_rows=64)
    loss2 = jax.block_until_ready(loss2)
    ref2 = _reference_loss(q2, qn2, a2, an2)
    assert jnp.allclose(loss2, ref2, rtol=1e-5, atol=1e-5), (loss2, ref2)

    print("KERNEL_OK")
</pallas_src>

<mosaic_0001>
module attributes {stable_mosaic.version = 11 : i64} {
  func.func @_sacn_loss_kernel(%arg0: i32, %arg1: memref<2x128xf32, #tpu.memory_space<vmem>>, %arg2: memref<2x128xf32, #tpu.memory_space<vmem>>, %arg3: memref<8x128xf32, #tpu.memory_space<vmem>>, %arg4: memref<8x128xf32, #tpu.memory_space<vmem>>, %arg5: memref<1x8x128xf32, #tpu.memory_space<vmem>>) attributes {dimension_semantics = [#tpu.dimension_semantics<parallel>], iteration_bounds = array<i64: 1>, scalar_prefetch = 0 : i64, scratch_operands = 0 : i64, tpu.core_type = #tpu.core_type<tc>, window_params = [{pipeline_mode = #tpu.pipeline_mode<synchronous>, transform_indices = @transform_0, window_bounds = array<i64: 2, 128>}, {pipeline_mode = #tpu.pipeline_mode<synchronous>, transform_indices = @transform_1, window_bounds = array<i64: 2, 128>}, {transform_indices = @transform_2, window_bounds = array<i64: 8, 128>}, {transform_indices = @transform_3, window_bounds = array<i64: 8, 128>}, {transform_indices = @transform_4, window_bounds = array<i64: 1, 8, 128>}]} {
    %c0 = arith.constant 0 : index
    %c0_0 = arith.constant 0 : index
    %0 = vector.load %arg3[%c0, %c0_0] : memref<8x128xf32, #tpu.memory_space<vmem>>, vector<8x128xf32>
    %c0_1 = arith.constant 0 : index
    %c0_2 = arith.constant 0 : index
    %1 = vector.load %arg4[%c0_1, %c0_2] : memref<8x128xf32, #tpu.memory_space<vmem>>, vector<8x128xf32>
    %2 = arith.mulf %0, %1 : vector<8x128xf32>
    %cst = arith.constant dense<0.000000e+00> : vector<8xf32>
    %3 = vector.multi_reduction <add>, %2, %cst [1] : vector<8x128xf32> to vector<8xf32>
    %4 = vector.shape_cast %3 : vector<8xf32> to vector<8x1xf32>
    %cst_3 = arith.constant 0.000000e+00 : f32
    %5 = vector.broadcast %cst_3 : f32 to vector<8x1xf32>
    %6 = arith.maximumf %4, %5 : vector<8x1xf32>
    %7 = math.absf %4 : vector<8x1xf32>
    %cst_4 = arith.constant 0.000000e+00 : f32
    %8 = vector.broadcast %cst_4 : f32 to vector<8x1xf32>
    %9 = arith.subf %8, %7 : vector<8x1xf32>
    %10 = math.exp %9 : vector<8x1xf32>
    %cst_5 = arith.constant 1.000000e+00 : f32
    %11 = vector.broadcast %cst_5 : f32 to vector<8x1xf32>
    %12 = arith.addf %11, %10 : vector<8x1xf32>
    %13 = math.log %12 : vector<8x1xf32>
    %14 = arith.addf %6, %13 : vector<8x1xf32>
    %cst_6 = arith.constant 1.000000e+02 : f32
    %15 = vector.broadcast %cst_6 : f32 to vector<8x1xf32>
    %16 = arith.minimumf %14, %15 : vector<8x1xf32>
    %17 = tpu.iota {dimensions = array<i32: 0>} : vector<8x1xi32>
    %c8_i32 = arith.constant 8 : i32
    %18 = arith.muli %arg0, %c8_i32 : i32
    %19 = vector.broadcast %18 : i32 to vector<8x1xi32>
    %20 = arith.addi %17, %19 : vector<8x1xi32>
    %c6_i32 = arith.constant 6 : i32
    %21 = vector.broadcast %c6_i32 : i32 to vector<8x1xi32>
    %22 = arith.cmpi slt, %20, %21 : vector<8x1xi32>
    %cst_7 = arith.constant 0.000000e+00 : f32
    %23 = vector.broadcast %cst_7 : f32 to vector<8x1xf32>
    %24 = arith.select %22, %16, %23 : vector<8x1xi1>, vector<8x1xf32>
    %cst_8 = arith.constant dense<0.000000e+00> : vector<1xf32>
    %25 = vector.multi_reduction <add>, %24, %cst_8 [0] : vector<8x1xf32> to vector<1xf32>
    %26 = vector.shape_cast %25 : vector<1xf32> to vector<1x1xf32>
    %c0_i32 = arith.constant 0 : i32
    %27 = arith.cmpi eq, %arg0, %c0_i32 : i32
    %28 = arith.extui %27 : i1 to i32
    %c0_i32_9 = arith.constant 0 : i32
    %29 = arith.cmpi ne, %28, %c0_i32_9 : i32
    scf.if %29 {
      %c0_12 = arith.constant 0 : index
      %c0_13 = arith.constant 0 : index
      %33 = vector.load %arg1[%c0_12, %c0_13] : memref<2x128xf32, #tpu.memory_space<vmem>>, vector<2x128xf32>
      %c0_14 = arith.constant 0 : index
      %c0_15 = arith.constant 0 : index
      %34 = vector.load %arg2[%c0_14, %c0_15] : memref<2x128xf32, #tpu.memory_space<vmem>>, vector<2x128xf32>
      %35 = arith.mulf %33, %34 : vector<2x128xf32>
      %cst_16 = arith.constant dense<0.000000e+00> : vector<2xf32>
      %36 = vector.multi_reduction <add>, %35, %cst_16 [1] : vector<2x128xf32> to vector<2xf32>
      %37 = vector.shape_cast %36 : vector<2xf32> to vector<2x1xf32>
      %cst_17 = arith.constant 0.000000e+00 : f32
      %38 = vector.broadcast %cst_17 : f32 to vector<2x1xf32>
      %39 = arith.subf %38, %37 : vector<2x1xf32>
      %cst_18 = arith.constant 0.000000e+00 : f32
      %40 = vector.broadcast %cst_18 : f32 to vector<2x1xf32>
      %41 = arith.maximumf %39, %40 : vector<2x1xf32>
      %42 = math.absf %39 : vector<2x1xf32>
      %cst_19 = arith.constant 0.000000e+00 : f32
      %43 = vector.broadcast %cst_19 : f32 to vector<2x1xf32>
      %44 = arith.subf %43, %42 : vector<2x1xf32>
      %45 = math.exp %44 : vector<2x1xf32>
      %cst_20 = arith.constant 1.000000e+00 : f32
      %46 = vector.broadcast %cst_20 : f32 to vector<2x1xf32>
      %47 = arith.addf %46, %45 : vector<2x1xf32>
      %48 = math.log %47 : vector<2x1xf32>
      %49 = arith.addf %41, %48 : vector<2x1xf32>
      %cst_21 = arith.constant 1.000000e+02 : f32
      %50 = vector.broadcast %cst_21 : f32 to vector<2x1xf32>
      %51 = arith.minimumf %49, %50 : vector<2x1xf32>
      %cst_22 = arith.constant dense<0.000000e+00> : vector<1xf32>
      %52 = vector.multi_reduction <add>, %51, %cst_22 [0] : vector<2x1xf32> to vector<1xf32>
      %53 = vector.shape_cast %52 : vector<1xf32> to vector<1x1xf32>
      %54 = arith.addf %26, %53 : vector<1x1xf32>
      %55 = vector.shape_cast %54 : vector<1x1xf32> to vector<1x1x1xf32>
      %56 = vector.shape_cast %55 : vector<1x1x1xf32> to vector<1x1x1xf32>
      %57 = vector.broadcast %56 : vector<1x1x1xf32> to vector<1x8x128xf32>
      %c0_23 = arith.constant 0 : index
      %c0_24 = arith.constant 0 : index
      %c0_25 = arith.constant 0 : index
      %58 = vector.load %arg5[%c0_23, %c0_24, %c0_25] : memref<1x8x128xf32, #tpu.memory_space<vmem>>, vector<1x8x128xf32>
      tpu.vector_store %arg5[%c0_23, %c0_24, %c0_25], %57 {strides = array<i32>} : memref<1x8x128xf32, #tpu.memory_space<vmem>>, vector<1x8x128xf32>,
    } else {
    }
    %c0_i32_10 = arith.constant 0 : i32
    %30 = arith.cmpi ne, %arg0, %c0_i32_10 : i32
    %31 = arith.extui %30 : i1 to i32
    %c0_i32_11 = arith.constant 0 : i32
    %32 = arith.cmpi ne, %31, %c0_i32_11 : i32
    scf.if %32 {
      %33 = vector.shape_cast %26 : vector<1x1xf32> to vector<1x1x1xf32>
      %34 = vector.shape_cast %33 : vector<1x1x1xf32> to vector<1x1x1xf32>
      %35 = vector.broadcast %34 : vector<1x1x1xf32> to vector<1x8x128xf32>
      %c0_12 = arith.constant 0 : index
      %c0_13 = arith.constant 0 : index
      %c0_14 = arith.constant 0 : index
      %36 = vector.load %arg5[%c0_12, %c0_13, %c0_14] : memref<1x8x128xf32, #tpu.memory_space<vmem>>, vector<1x8x128xf32>
      tpu.vector_store %arg5[%c0_12, %c0_13, %c0_14], %35 {strides = array<i32>} : memref<1x8x128xf32, #tpu.memory_space<vmem>>, vector<1x8x128xf32>,
    } else {
    }
    return
  }
  func.func @transform_0(%arg0: i32) -> (i32, i32) {
    %c0_i32 = arith.constant 0 : i32
    %c0_i32_0 = arith.constant 0 : i32
    %c0_i32_1 = arith.constant 0 : i32
    return %c0_i32, %c0_i32_0 : i32, i32
  }
  func.func @transform_1(%arg0: i32) -> (i32, i32) {
    %c0_i32 = arith.constant 0 : i32
    %c0_i32_0 = arith.constant 0 : i32
    %c0_i32_1 = arith.constant 0 : i32
    return %c0_i32, %c0_i32_0 : i32, i32
  }
  func.func @transform_2(%arg0: i32) -> (i32, i32) {
    %c0_i32 = arith.constant 0 : i32
    %c0_i32_0 = arith.constant 0 : i32
    return %arg0, %c0_i32 : i32, i32
  }
  func.func @transform_3(%arg0: i32) -> (i32, i32) {
    %c0_i32 = arith.constant 0 : i32
    %c0_i32_0 = arith.constant 0 : i32
    return %arg0, %c0_i32 : i32, i32
  }
  func.func @transform_4(%arg0: i32) -> (i32, i32, i32) {
    %c0_i32 = arith.constant 0 : i32
    %c0_i32_0 = arith.constant 0 : i32
    %c0_i32_1 = arith.constant 0 : i32
    return %arg0, %c0_i32, %c0_i32_0 : i32, i32, i32
  }
}

</mosaic_0001>

<bundles_post_ra>
// kernel: tpu_custom_call.1
= control target key start
LH: loop header
LB: loop body
LE: loop exit
PB: predicated region body
PF: predicated region fallthrough
CT: control target
= control target key end

     0   :  { %9 = vsyncpa [#allocation3], 0  ;;  %s314_s0 = inlined_call_operand.hbm [shape: f32[2,128], index: 0, kind: input, shape index: {}]   ;;  %s315_s1 = inlined_call_operand.hbm [shape: f32[2,128], index: 1, kind: input, shape index: {}]   ;;  %s316_s2 = inlined_call_operand.hbm [shape: f32[8,128], index: 2, kind: input, shape index: {}]   ;;  %s317_s3 = inlined_call_operand.hbm [shape: f32[8,128], index: 3, kind: input, shape index: {}]   ;;  %s318_s4 = inlined_call_operand.hbm [shape: f32[1,8,128], index: 4, kind: output, shape index: {}]  }
   0x1   :  { %10 = vsyncpa [#allocation6], 0 }
   0x2   :  { %11 = vsyncpa [#allocation9], 0 }
   0x3   :  { %12 = vsyncpa [#allocation4], 0  ;;  %s267_s15 = smov [#allocation5]   ;;  %s268_s17 = smov [#allocation2]  }
   0x4   :  { %s29_s16 = sshll.u32 %s267_s15, 4  ;;  %s19_s18 = sshll.u32 %s268_s17, 4  ;;  %s30_s16 = int_to_ptr.vmem [resolvable:$true] %s29_s16  ;;  %s20_s18 = int_to_ptr.vmem [resolvable:$true] %s19_s18 }
   0x5   :  { %s167_s19 = scalar_lea.vmem %s30_s16, 32  ;;  %p172_p1 = scmp.lt.s32.totalorder %s30_s16, %s30_s16 }
   0x6   :  { %p168_p0 = scmp.ne.s32.totalorder %s30_s16, %s167_s19  ;;  %p173_p2 = scmp.lt.s32.totalorder %s167_s19, %s167_s19 }
   0x8   :  { %p174_p3 = por %p173_p2, %p172_p1 }
   0xa   :  { %p175_p4 = pnand %p174_p3, %p168_p0 }
   0xc   :  { %178 = shalt.err (!%p175_p4)
}
   0xd   :  { %32 = dma.hbm_to_vmem [thread:$0]  %s315_s1, 32, %s30_s16, [#allocation6]  }
   0xe   :  { %s187_s22 = scalar_lea.vmem %s20_s18, 32  ;;  %p192_p6 = scmp.lt.s32.totalorder %s20_s18, %s20_s18 }
   0xf   :  { %p188_p5 = scmp.ne.s32.totalorder %s20_s18, %s187_s22  ;;  %p193_p7 = scmp.lt.s32.totalorder %s187_s22, %s187_s22 }
  0x11   :  { %p194_p8 = por %p193_p7, %p192_p6 }
  0x13   :  { %p195_p9 = pnand %p194_p8, %p188_p5 }
  0x15   :  { %198 = shalt.err (!%p195_p9)
}
  0x16   :  { %22 = dma.hbm_to_vmem [thread:$0]  %s314_s0, 32, %s20_s18, [#allocation3]  }
  0x17   :  { %s269_s25 = smov [#allocation7]   ;;  %s270_s27 = smov [#allocation8]  }
  0x18   :  { %s39_s26 = sshll.u32 %s269_s25, 4  ;;  %s49_s28 = sshll.u32 %s270_s27, 4  ;;  %s40_s26 = int_to_ptr.vmem [resolvable:$true] %s39_s26  ;;  %s50_s28 = int_to_ptr.vmem [resolvable:$true] %s49_s28 }
  0x19   :  { %s207_s29 = scalar_lea.vmem %s40_s26, 128  ;;  %p212_p11 = scmp.lt.s32.totalorder %s40_s26, %s40_s26 }
  0x1a   :  { %p208_p10 = scmp.ne.s32.totalorder %s40_s26, %s207_s29  ;;  %p213_p12 = scmp.lt.s32.totalorder %s207_s29, %s207_s29 }
  0x1c   :  { %p214_p13 = por %p213_p12, %p212_p11 }
  0x1e   :  { %p215_p0 = pnand %p214_p13, %p208_p10 }
  0x20   :  { %218 = shalt.err (!%p215_p0)
}
  0x21   :  { %42 = dma.hbm_to_vmem [thread:$0]  %s316_s2, 128, %s40_s26, [#allocation6]  }
  0x22   :  { %s227_s5 = scalar_lea.vmem %s50_s28, 128  ;;  %p232_p2 = scmp.lt.s32.totalorder %s50_s28, %s50_s28 }
  0x23   :  { %p228_p1 = scmp.ne.s32.totalorder %s50_s28, %s227_s5  ;;  %p233_p3 = scmp.lt.s32.totalorder %s227_s5, %s227_s5 }
  0x25   :  { %p234_p4 = por %p233_p3, %p232_p2 }
  0x27   :  { %p235_p5 = pnand %p234_p4, %p228_p1 }
  0x29   :  { %238 = shalt.err (!%p235_p5)
}
  0x2a   :  { %52 = dma.hbm_to_vmem [thread:$0]  %s317_s3, 128, %s50_s28, [#allocation9]  }
  0x2b   :  { %259 = dma.done.wait [#allocation3], 32  }
  0x2c   :  { %260 = vsyncadd [#allocation3], 4294967264 }
  0x2d   :  { %261 = dma.done.wait [#allocation6], 160  }
  0x2e   :  { %262 = vsyncadd [#allocation6], 4294967136 }
  0x2f   :  { %263 = dma.done.wait [#allocation9], 128  }
  0x30   :  { %264 = vsyncadd [#allocation9], 4294967168  ;;  %v97_v0 = vld [vmem:[#allocation2] sm:$0x3]  ;;  %v98_v1 = vld [vmem:[#allocation5] sm:$0x3]  ;;  %v80_v20 = vlaneseq }
  0x31   :  { %vm100_vm0 = vcmask 1041408   ;;  %v99_v2 = vmul.f32 %v98_v1, %v97_v0  ;;  %v65_v3 = vld [vmem:[#allocation7] sm:$0xff]  ;;  %v66_v4 = vld [vmem:[#allocation8] sm:$0xff]  ;;  %s271_s2 = smov [#allocation10]  }
  0x32   :  { %v67_v6 = vmul.f32 %v66_v4, %v65_v3  ;;  %v81_v25 = vshrl.u32 %v80_v20, 7  ;;  %s135_s3 = sshll.u32 %s271_s2, 4  ;;  %s136_s3 = int_to_ptr.vmem [resolvable:$true] %s135_s3 }
  0x33   :  { %v101_v5 = vsel %vm100_vm0, %v99_v2, 0.0  ;;  %s239_s7 = scalar_lea.vmem %s136_s3, 128  ;;  %p244_p7 = scmp.lt.s32.totalorder %s136_s3, %s136_s3 }
  0x34   :  { %102 = vadd.xlane.f32.xlu0 %v101_v5  ;;  %vm85_vm1 = vcmp.lt.s32.totalorder %v81_v25, 6  ;;  %p240_p6 = scmp.ne.s32.totalorder %s136_s3, %s239_s7  ;;  %p245_p8 = scmp.lt.s32.totalorder %s239_s7, %s239_s7 }
  0x36   :  { %p246_p9 = por %p245_p8, %p244_p7 }
  0x38   :  { %68 = vadd.xlane.f32.xlu0 %v67_v6  ;;  %p247_p10 = pnand %p246_p9, %p240_p6 }
  0xbd   :  { %v103_v7 = vpop.xlane.xlu0 %102 }
  0xbe   :  { %v104_v8 = vsub.f32 0.0, %v103_v7 }
  0xc0   :  { %v106_v9 = vand.u32 2147483647, %v104_v8  ;;  %v105_v22 = vmax.f32 %v104_v8, 0.0 }
  0xc1   :  { %v69_v10 = vpop.xlane.xlu0 %68 }
  0xc2   :  { %v107_v11 = vsub.f32 0.0, %v106_v9  ;;  %v71_v12 = vand.u32 2147483647, %v69_v10  ;;  %v70_v27 = vmax.f32 %v69_v10, 0.0 }
  0xc4   :  { %v108_v13 = vmul.f32 1.442695, %v107_v11  ;;  %v72_v14 = vsub.f32 0.0, %v71_v12 }
  0xc6   :  { %151 = vpow2.f32 %v108_v13  ;;  %v73_v15 = vmul.f32 1.442695, %v72_v14 }
  0xc8   :  { %153 = vpow2.f32 %v73_v15 }
  0xd3   :  { %v152_v16 = vpop.eup %151 }
  0xd4   :  { %v110_v17 = vadd.f32 1.0, %v152_v16 }
  0xd5   :  { %v154_v18 = vpop.eup %153 }
  0xd6   :  { %155 = vlog2.f32 %v110_v17  ;;  %v75_v19 = vadd.f32 1.0, %v154_v18 }
  0xd8   :  { %157 = vlog2.f32 %v75_v19 }
  0xe3   :  { %v156_v21 = vpop.eup %155 }
  0xe4   :  { %v112_v23 = vmul.f32 0.6931472, %v156_v21 }
  0xe5   :  { %v158_v24 = vpop.eup %157 }
  0xe6   :  { %v113_v26 = vadd.f32 %v112_v23, %v105_v22  ;;  %v77_v28 = vmul.f32 0.6931472, %v158_v24 }
  0xe8   :  { %v114_v29 = vmin.f32 %v113_v26, 100.0  ;;  %v78_v30 = vadd.f32 %v77_v28, %v70_v27 }
  0xea   :  { %v115_v31 = vsel %vm100_vm0, %v114_v29, 0.0  ;;  %v79_v32 = vmin.f32 %v78_v30, 100.0 }
  0xeb   :  { %v116_v33 = vrot.slane %v115_v31, 4 }
  0xec   :  { %v86_v34 = vsel %vm85_vm1, %v79_v32, 0.0 }
  0xed   :  { %v117_v35 = vadd.f32 %v116_v33, %v115_v31  ;;  %v87_v36 = vrot.slane %v86_v34, 4 }
  0xef   :  { %v88_v37 = vadd.f32 %v87_v36, %v86_v34  ;;  %v118_v38 = vrot.slane %v117_v35, 2 }
  0xf1   :  { %v89_v39 = vrot.slane %v88_v37, 2  ;;  %v119_v40 = vadd.f32 %v118_v38, %v117_v35 }
  0xf3   :  { %v90_v41 = vadd.f32 %v89_v39, %v88_v37  ;;  %v120_v42 = vrot.slane %v119_v40, 1 }
  0xf5   :  { %v91_v43 = vrot.slane %v90_v41, 1  ;;  %v121_v45 = vadd.f32 %v120_v42, %v119_v40 }
  0xf7   :  { %v92_v44 = vadd.f32 %v91_v43, %v90_v41 }
  0xf9   :  { %v122_v46 = vadd.f32 %v121_v45, %v92_v44 }
  0xfb   :  { %123 = vst [vmem:[#allocation10] sm:$0xff] %v122_v46 }
  0xfc   :  { %250 = shalt.err (!%p247_p10)
}
  0xfd   :  { %138 = dma.vmem_to_hbm [thread:$0]  %s136_s3, 128, %s318_s4, [#allocation4]  }
  0xfe   :  { %265 = dma.done.wait [#allocation4], 128  }
  0xff   :  { %266 = vsyncadd [#allocation4], 4294967168 }
 0x100   :  { %142 = vsyncpa [#allocation3], 1 }
 0x101   :  { %143 = vsyncpa [#allocation6], 1 }
 0x102   :  { %144 = vsyncpa [#allocation9], 1 }
 0x103   :  { %145 = vsyncpa [#allocation4], 1 }

</bundles_post_ra>
